<compile_context>
chip_gen: v5e
topology: v5e:2x2
jax: 0.10.0
libtpu: 0.0.40
codegen_flags: <defaults>
</compile_context>

<pallas_src>
from functools import partial

import jax
import jax.numpy as jnp
from jax.experimental import pallas as pl
from jax.experimental.pallas import tpu as pltpu

LANE = 128      # lane width (last dim)
BATCH_ALIGN = 16  # sublane-dense for both f32 (8) and bf16 (16) layouts


def _round_up(n, m):
    return ((n + m - 1) // m) * m


def _pick_tile_b(batch):
    """Batch tile: fill the MXU and keep >=2 grid steps when possible."""
    if batch >= 512:
        return 256          # feeds v6e/v7x 256x256 MXU; >=2 steps for v7x TCs
    if batch >= 256:
        return 128
    return _round_up(batch, BATCH_ALIGN)


# --------------------------------------------------------------------------
# Kernel: one batch tile of  y = ReLU(x @ W1 + b1) @ W2 + b2
# --------------------------------------------------------------------------
def mlp_kernel(x_ref, w1_ref, b1_ref, w2_ref, b2_ref, o_ref):
    # Cast x to the MXU dtype on the VPU (co-issues with MXU work).
    x = x_ref[...].astype(w1_ref.dtype)
    # fc1 on the MXU: bf16 operands, f32 accumulation.
    h = jnp.dot(x, w1_ref[...], preferred_element_type=jnp.float32)
    # Bias add + ReLU in f32 on the VPU (no bf16 VALU needed -> v5e-safe).
    h = jnp.maximum(h + b1_ref[...], 0.0)
    # fc2: hidden activation back to bf16 for the MXU fast path.
    y = jnp.dot(h.astype(w2_ref.dtype), w2_ref[...],
                preferred_element_type=jnp.float32)
    o_ref[...] = (y + b2_ref[...]).astype(o_ref.dtype)


# --------------------------------------------------------------------------
# One-time parameter preparation (padding + bf16 cast, off the hot path)
# --------------------------------------------------------------------------
def prepare_mlp_params(w1, b1, w2, b2):
    """Pad features to the 128-lane width and cast weights to bf16 once.

    Weights are stored [in_features, out_features] (pre-transposed vs
    PyTorch's nn.Linear).  Zero padding is exact: padded input features hit
    zero weight rows, padded hidden columns have zero weights + zero bias
    (ReLU(0)=0), and padded output columns are sliced off in the wrapper.
    """
    input_dim, hidden_dim = w1.shape
    output_dim = w2.shape[1]
    pin = _round_up(input_dim, LANE)
    phid = _round_up(hidden_dim, LANE)
    pout = _round_up(output_dim, LANE)

    mm_dt = jnp.bfloat16
    w1p = jnp.pad(w1, ((0, pin - input_dim), (0, phid - hidden_dim))).astype(mm_dt)
    w2p = jnp.pad(w2, ((0, phid - hidden_dim), (0, pout - output_dim))).astype(mm_dt)
    b1p = jnp.pad(b1.reshape(1, -1), ((0, 0), (0, phid - hidden_dim))).astype(jnp.float32)
    b2p = jnp.pad(b2.reshape(1, -1), ((0, 0), (0, pout - output_dim))).astype(jnp.float32)
    return w1p, b1p, w2p, b2p


# --------------------------------------------------------------------------
# Forward wrapper (hot path: only x is padded/streamed per call)
# --------------------------------------------------------------------------
@partial(jax.jit, static_argnames=("output_dim",))
def mlp_forward(x, w1p, b1p, w2p, b2p, output_dim):
    """Fused MLP forward on pre-padded/pre-cast params.

    Returns (y, None) to match the PyTorch module's forward signature.
    """
    batch, input_dim = x.shape
    pin, phid = w1p.shape
    pout = w2p.shape[1]
    out_dtype = x.dtype

    tile_b = _pick_tile_b(batch)
    pbatch = _round_up(batch, tile_b)

    # Pad x only when needed (zero rows/cols are exact, see prepare_mlp_params).
    if pbatch != batch or pin != input_dim:
        xp = jnp.pad(x, ((0, pbatch - batch), (0, pin - input_dim)))
    else:
        xp = x

    grid = (pbatch // tile_b,)

    # Resident weights/biases: constant block index -> loaded once; single
    # buffer (no double buffering needed for a block that never changes).
    resident = dict(pipeline_mode=pl.Buffered(1))

    grid_spec = pltpu.PrefetchScalarGridSpec(
        num_scalar_prefetch=0,
        grid=grid,
        in_specs=[
            # x: one batch tile per grid step, pipelined HBM<->VMEM (2-deep).
            pl.BlockSpec((tile_b, pin), lambda i: (i, 0)),
            pl.BlockSpec((pin, phid), lambda i: (0, 0), **resident),
            pl.BlockSpec((1, phid), lambda i: (0, 0), **resident),
            pl.BlockSpec((phid, pout), lambda i: (0, 0), **resident),
            pl.BlockSpec((1, pout), lambda i: (0, 0), **resident),
        ],
        out_specs=pl.BlockSpec((tile_b, pout), lambda i: (i, 0)),
    )

    # Explicit VMEM budget: resident weights/biases (single-buffered) +
    # double-buffered x/out tiles + f32 hidden/result scratch + headroom.
    # Capped at 56 MiB => safe on every generation (v7x has 64 MiB physical).
    resident_bytes = (w1p.size * w1p.dtype.itemsize + w2p.size * w2p.dtype.itemsize
                      + b1p.size * b1p.dtype.itemsize + b2p.size * b2p.dtype.itemsize)
    stream_bytes = 2 * tile_b * pin * xp.dtype.itemsize \
                 + 2 * tile_b * pout * jnp.dtype(out_dtype).itemsize
    scratch_bytes = tile_b * phid * 4 + tile_b * pout * 4
    vmem_limit = int(min(max(resident_bytes + stream_bytes + scratch_bytes
                             + (4 << 20), 32 << 20), 56 << 20))

    flops = 2 * pbatch * pin * phid + 2 * pbatch * phid * pout
    bytes_accessed = (xp.size * xp.dtype.itemsize
                      + resident_bytes
                      + pbatch * pout * jnp.dtype(out_dtype).itemsize)

    out = pl.pallas_call(
        mlp_kernel,
        out_shape=jax.ShapeDtypeStruct((pbatch, pout), out_dtype),
        grid_spec=grid_spec,
        compiler_params=pltpu.CompilerParams(
            dimension_semantics=("parallel",),   # shards batch grid across v7x TCs
            vmem_limit_bytes=vmem_limit,
        ),
        cost_estimate=pl.CostEstimate(
            flops=flops, transcendentals=0, bytes_accessed=bytes_accessed),
    )(xp, w1p, b1p, w2p, b2p)

    # Strip padding; match the PyTorch module's return signature (x, None).
    return out[:batch, :output_dim], None


# --------------------------------------------------------------------------
# Init mimicking nn.Linear's default uniform init (weights as [in, out]).
# --------------------------------------------------------------------------
def init_mlp_params(key, input_dim, hidden_dim, output_dim):
    k1, k2, k3, k4 = jax.random.split(key, 4)
    bound1 = 1.0 / (input_dim ** 0.5)
    bound2 = 1.0 / (hidden_dim ** 0.5)
    w1 = jax.random.uniform(k1, (input_dim, hidden_dim), jnp.float32,
                            minval=-bound1, maxval=bound1)
    b1 = jax.random.uniform(k2, (1, hidden_dim), jnp.float32,
                            minval=-bound1, maxval=bound1)
    w2 = jax.random.uniform(k3, (hidden_dim, output_dim), jnp.float32,
                            minval=-bound2, maxval=bound2)
    b2 = jax.random.uniform(k4, (1, output_dim), jnp.float32,
                            minval=-bound2, maxval=bound2)
    return w1, b1, w2, b2


if __name__ == "__main__":
    batch, input_dim, hidden_dim, output_dim = 8, 32, 64, 16

    key = jax.random.PRNGKey(0)
    k_x, k_p = jax.random.split(key)
    x = jax.random.normal(k_x, (batch, input_dim), jnp.float32)
    w1, b1, w2, b2 = init_mlp_params(k_p, input_dim, hidden_dim, output_dim)

    # One-time weight preparation (padding + bf16 cast), then the fused kernel.
    params = prepare_mlp_params(w1, b1, w2, b2)
    out, aux = mlp_forward(x, *params, output_dim=output_dim)
    out = jax.block_until_ready(out)

    # Reference in plain f32 JAX (same math as the PyTorch module).
    ref_f32 = jnp.maximum(x @ w1 + b1, 0.0) @ w2 + b2
    # Reference with matched bf16 quantization of the matmul operands.
    xb = x.astype(jnp.bfloat16).astype(jnp.float32)
    w1b = w1.astype(jnp.bfloat16).astype(jnp.float32)
    w2b = w2.astype(jnp.bfloat16).astype(jnp.float32)
    hb = jnp.maximum(xb @ w1b + b1, 0.0)
    ref_bf16 = hb.astype(jnp.bfloat16).astype(jnp.float32) @ w2b + b2

    assert aux is None
    assert out.shape == (batch, output_dim)
    assert jnp.allclose(out, ref_bf16, atol=1e-3, rtol=1e-3)
    assert jnp.allclose(out, ref_f32, atol=5e-2, rtol=5e-2)

    print("KERNEL_OK")
</pallas_src>

<mosaic_0001>
module attributes {stable_mosaic.version = 11 : i64} {
  func.func @mlp_kernel(%arg0: i32, %arg1: memref<16x128xf32, #tpu.memory_space<vmem>>, %arg2: memref<128x128xbf16, #tpu.memory_space<vmem>>, %arg3: memref<1x128xf32, #tpu.memory_space<vmem>>, %arg4: memref<128x128xbf16, #tpu.memory_space<vmem>>, %arg5: memref<1x128xf32, #tpu.memory_space<vmem>>, %arg6: memref<16x128xf32, #tpu.memory_space<vmem>>) attributes {dimension_semantics = [#tpu.dimension_semantics<parallel>], iteration_bounds = array<i64: 1>, scalar_prefetch = 0 : i64, scratch_operands = 0 : i64, tpu.core_type = #tpu.core_type<tc>, window_params = [{transform_indices = @transform_0, window_bounds = array<i64: 16, 128>}, {pipeline_mode = #tpu.pipeline_mode<synchronous>, transform_indices = @transform_1, window_bounds = array<i64: 128, 128>}, {pipeline_mode = #tpu.pipeline_mode<synchronous>, transform_indices = @transform_2, window_bounds = array<i64: 1, 128>}, {pipeline_mode = #tpu.pipeline_mode<synchronous>, transform_indices = @transform_3, window_bounds = array<i64: 128, 128>}, {pipeline_mode = #tpu.pipeline_mode<synchronous>, transform_indices = @transform_4, window_bounds = array<i64: 1, 128>}, {transform_indices = @transform_5, window_bounds = array<i64: 16, 128>}]} {
    %c0 = arith.constant 0 : index
    %c0_0 = arith.constant 0 : index
    %0 = vector.load %arg1[%c0, %c0_0] : memref<16x128xf32, #tpu.memory_space<vmem>>, vector<16x128xf32>
    %1 = arith.truncf %0 : vector<16x128xf32> to vector<16x128xbf16>
    %c0_1 = arith.constant 0 : index
    %c0_2 = arith.constant 0 : index
    %2 = vector.load %arg2[%c0_1, %c0_2] : memref<128x128xbf16, #tpu.memory_space<vmem>>, vector<128x128xbf16>
    %cst = arith.constant dense<0.000000e+00> : vector<16x128xf32>
    %3 = tpu.matmul %1, %2, %cst {dimension_numbers = #tpu.dot_dimension_numbers<[1], [0], [0], [1], [0, 0, 1, 1], [], []>} : vector<16x128xbf16>, vector<128x128xbf16>, vector<16x128xf32> -> vector<16x128xf32>
    %c0_3 = arith.constant 0 : index
    %c0_4 = arith.constant 0 : index
    %4 = vector.load %arg3[%c0_3, %c0_4] : memref<1x128xf32, #tpu.memory_space<vmem>>, vector<1x128xf32>
    %5 = vector.broadcast %4 : vector<1x128xf32> to vector<16x128xf32>
    %6 = arith.addf %3, %5 : vector<16x128xf32>
    %cst_5 = arith.constant 0.000000e+00 : f32
    %7 = vector.broadcast %cst_5 : f32 to vector<16x128xf32>
    %8 = arith.maximumf %6, %7 : vector<16x128xf32>
    %9 = arith.truncf %8 : vector<16x128xf32> to vector<16x128xbf16>
    %c0_6 = arith.constant 0 : index
    %c0_7 = arith.constant 0 : index
    %10 = vector.load %arg4[%c0_6, %c0_7] : memref<128x128xbf16, #tpu.memory_space<vmem>>, vector<128x128xbf16>
    %cst_8 = arith.constant dense<0.000000e+00> : vector<16x128xf32>
    %11 = tpu.matmul %9, %10, %cst_8 {dimension_numbers = #tpu.dot_dimension_numbers<[1], [0], [0], [1], [0, 0, 1, 1], [], []>} : vector<16x128xbf16>, vector<128x128xbf16>, vector<16x128xf32> -> vector<16x128xf32>
    %c0_9 = arith.constant 0 : index
    %c0_10 = arith.constant 0 : index
    %12 = vector.load %arg5[%c0_9, %c0_10] : memref<1x128xf32, #tpu.memory_space<vmem>>, vector<1x128xf32>
    %13 = vector.broadcast %12 : vector<1x128xf32> to vector<16x128xf32>
    %14 = arith.addf %11, %13 : vector<16x128xf32>
    %c0_11 = arith.constant 0 : index
    %c0_12 = arith.constant 0 : index
    %15 = vector.load %arg6[%c0_11, %c0_12] : memref<16x128xf32, #tpu.memory_space<vmem>>, vector<16x128xf32>
    tpu.vector_store %arg6[%c0_11, %c0_12], %14 {strides = array<i32>} : memref<16x128xf32, #tpu.memory_space<vmem>>, vector<16x128xf32>,
    return
  }
  func.func @transform_0(%arg0: i32) -> (i32, i32) {
    %c0_i32 = arith.constant 0 : i32
    %c0_i32_0 = arith.constant 0 : i32
    return %arg0, %c0_i32 : i32, i32
  }
  func.func @transform_1(%arg0: i32) -> (i32, i32) {
    %c0_i32 = arith.constant 0 : i32
    %c0_i32_0 = arith.constant 0 : i32
    %c0_i32_1 = arith.constant 0 : i32
    return %c0_i32, %c0_i32_0 : i32, i32
  }
  func.func @transform_2(%arg0: i32) -> (i32, i32) {
    %c0_i32 = arith.constant 0 : i32
    %c0_i32_0 = arith.constant 0 : i32
    %c0_i32_1 = arith.constant 0 : i32
    return %c0_i32, %c0_i32_0 : i32, i32
  }
  func.func @transform_3(%arg0: i32) -> (i32, i32) {
    %c0_i32 = arith.constant 0 : i32
    %c0_i32_0 = arith.constant 0 : i32
    %c0_i32_1 = arith.constant 0 : i32
    return %c0_i32, %c0_i32_0 : i32, i32
  }
  func.func @transform_4(%arg0: i32) -> (i32, i32) {
    %c0_i32 = arith.constant 0 : i32
    %c0_i32_0 = arith.constant 0 : i32
    %c0_i32_1 = arith.constant 0 : i32
    return %c0_i32, %c0_i32_0 : i32, i32
  }
  func.func @transform_5(%arg0: i32) -> (i32, i32) {
    %c0_i32 = arith.constant 0 : i32
    %c0_i32_0 = arith.constant 0 : i32
    return %arg0, %c0_i32 : i32, i32
  }
}

</mosaic_0001>

<bundles_post_ra>
// kernel: mlp_forward.1
= control target key start
LH: loop header
LB: loop body
LE: loop exit
PB: predicated region body
PF: predicated region fallthrough
CT: control target
= control target key end

     0   :  { %10 = vsyncpa [#allocation3], 0  ;;  %s426_s0 = inlined_call_operand.vmem [shape: f32[16,128], index: 0, kind: input, shape index: {}]   ;;  %s427_s1 = inlined_call_operand.hbm [shape: bf16[128,128], index: 1, kind: input, shape index: {}]   ;;  %s428_s2 = inlined_call_operand.vmem [shape: f32[1,128], index: 2, kind: input, shape index: {}]   ;;  %s429_s3 = inlined_call_operand.hbm [shape: bf16[128,128], index: 3, kind: input, shape index: {}]   ;;  %s430_s4 = inlined_call_operand.vmem [shape: f32[1,128], index: 4, kind: input, shape index: {}]   ;;  %s431_s5 = inlined_call_operand.vmem [shape: f32[16,128], index: 5, kind: output, shape index: {}]  }
   0x1   :  { %s18_s20 = sshll.u32 %s427_s1, 4  ;;  %s19_s20 = int_to_ptr.hbm [resolvable:$true] %s18_s20 }
   0x2   :  { %11 = vsyncpa [#allocation5], 0  ;;  %s368_s21 = smov [#allocation2]   ;;  %s33_s25 = sshll.u32 %s429_s3, 4  ;;  %s34_s25 = int_to_ptr.hbm [resolvable:$true] %s33_s25 }
   0x3   :  { %s20_s22 = sshll.u32 %s368_s21, 4  ;;  %s369_s26 = smov 64   ;;  %s21_s22 = int_to_ptr.vmem [resolvable:$true] %s20_s22 }
   0x4   :  { %s370_s27 = smov 4   ;;  %s371_s28 = smov [#allocation4]  }
   0x5   :  { %26 = dma.hbm_to_vmem [thread:$0]  %s19_s20, 1024, %s21_s22, [#allocation3], %s369_s26, %s369_s26, %s370_s27  }
   0x6   :  { %s35_s29 = sshll.u32 %s371_s28, 4  ;;  %s36_s29 = int_to_ptr.vmem [resolvable:$true] %s35_s29 }
   0x7   :  { %41 = dma.hbm_to_vmem [thread:$0]  %s34_s25, 1024, %s36_s29, [#allocation5], %s369_s26, %s369_s26, %s370_s27  }
   0x8   :  { %364 = dma.done.wait [#allocation3], 1024  }
   0x9   :  { %365 = vsyncadd [#allocation3], 4294966272 }
   0xa   :  { %366 = dma.done.wait [#allocation5], 1024  }
   0xb   :  { %367 = vsyncadd [#allocation5], 4294966272  ;;  %v301_v0 = vld [vmem:[#allocation2 + $0x38] sm:$0xff]  ;;  %v300_v1 = vld [vmem:[#allocation2 + $0x30] sm:$0xff] }
   0xc   :  { %123 = vmatpush.bf16.msra.mxu0 %v301_v0  ;;  %v309_v2 = vld [vmem:[#allocation4 + $0x38] sm:$0xff]  ;;  %v308_v3 = vld [vmem:[#allocation4 + $0x30] sm:$0xff]  ;;  %v299_v4 = vld [vmem:[#allocation2 + $0x28] sm:$0xff] }
   0xd   :  { %208 = vmatpush.bf16.msra.mxu1 %v309_v2  ;;  %v307_v5 = vld [vmem:[#allocation4 + $0x28] sm:$0xff]  ;;  %v298_v6 = vld [vmem:[#allocation2 + $0x20] sm:$0xff]  ;;  %v297_v8 = vld [vmem:[#allocation2 + $0x18] sm:$0xff] }
   0xe   :  { %v306_v7 = vld [vmem:[#allocation4 + $0x20] sm:$0xff]  ;;  %v296_v9 = vld [vmem:[#allocation2 + $0x10] sm:$0xff]  ;;  %v295_v10 = vld [vmem:[#allocation2 + $0x8] sm:$0xff] }
   0xf   :  { %v294_v11 = vld [vmem:[#allocation2] sm:$0xff]  ;;  %v53_v13 = vld [vmem:[%s426_s0 + $0x8] sm:$0xff]  ;;  %v305_v15 = vld [vmem:[#allocation4 + $0x18] sm:$0xff] }
  0x10   :  { %124 = vmatpush.bf16.msra.mxu0 %v300_v1  ;;  %v52_v12 = vld [vmem:[%s426_s0] sm:$0xff]  ;;  %v304_v16 = vld [vmem:[#allocation4 + $0x10] sm:$0xff]  ;;  %v303_v17 = vld [vmem:[#allocation4 + $0x8] sm:$0xff] }
  0x11   :  { %209 = vmatpush.bf16.msra.mxu1 %v308_v3  ;;  %v54_v14 = vpack.c.bf16 %v53_v13, %v52_v12  ;;  %v302_v18 = vld [vmem:[#allocation4] sm:$0xff] }
  0x12   :  { %v314_v20 = vld [vmem:[%s428_s2] ss:$0 sm:$0xff] }
  0x13   :  { %v315_v27 = vld [vmem:[%s430_s4] ss:$0 sm:$0xff] }
  0x14   :  { %125 = vmatpush.bf16.msra.mxu0 %v299_v4 }
  0x15   :  { %210 = vmatpush.bf16.msra.mxu1 %v307_v5 }
  0x18   :  { %126 = vmatpush.bf16.msra.mxu0 %v298_v6 }
  0x19   :  { %211 = vmatpush.bf16.msra.mxu1 %v306_v7 }
  0x1c   :  { %127 = vmatpush.bf16.msra.mxu0 %v297_v8 }
  0x1d   :  { %212 = vmatpush.bf16.msra.mxu1 %v305_v15 }
  0x20   :  { %128 = vmatpush.bf16.msra.mxu0 %v296_v9 }
  0x21   :  { %213 = vmatpush.bf16.msra.mxu1 %v304_v16 }
  0x24   :  { %129 = vmatpush.bf16.msra.mxu0 %v295_v10 }
  0x25   :  { %214 = vmatpush.bf16.msra.mxu1 %v303_v17 }
  0x28   :  { %130 = vmatpush.bf16.msra.mxu0 %v294_v11 }
  0x29   :  { %215 = vmatpush.bf16.msra.mxu1 %v302_v18 }
  0x2b   :  { %131 = vmatmul.bf16.vlgmr.msra.gmra.mxu0 %v54_v14 }
  0xa8   :  { %v132_v19 = vpop.f32.mrf.mxu0 }
  0xa9   :  { %v133_v21 = vadd.f32 %v314_v20, %v132_v19 }
  0xab   :  { %v137_v24 = vmax.f32 %v133_v21, 0.0 }
  0xb0   :  { %v134_v22 = vpop.f32.mrf.mxu0 }
  0xb1   :  { %v135_v23 = vadd.f32 %v314_v20, %v134_v22 }
  0xb3   :  { %v138_v25 = vmax.f32 %v135_v23, 0.0 }
  0xb5   :  { %v139_v26 = vpack.c.bf16 %v138_v25, %v137_v24 }
  0xb7   :  { %216 = vmatmul.bf16.vlgmr.msra.gmra.mxu1 %v139_v26 }
 0x134   :  { %v217_v28 = vpop.f32.mrf.mxu1 }
 0x135   :  { %v218_v29 = vadd.f32 %v315_v27, %v217_v28 }
 0x137   :  { %222 = vst [vmem:[%s431_s5] sm:$0xff] %v218_v29 }
 0x13c   :  { %v219_v30 = vpop.f32.mrf.mxu1 }
 0x13d   :  { %v220_v31 = vadd.f32 %v315_v27, %v219_v30 }
 0x13f   :  { %223 = vst [vmem:[%s431_s5 + $0x8] sm:$0xff] %v220_v31 }
 0x140   :  { %228 = vsyncpa [#allocation3], 1 }
 0x141   :  { %229 = vsyncpa [#allocation5], 1 }

</bundles_post_ra>
